<compile_context>
chip_gen: v7x
topology: tpu7x:2x2x1
jax: 0.10.0
libtpu: 0.0.40
codegen_flags: <defaults>
</compile_context>

<pallas_src>
import functools

import jax
import jax.numpy as jnp
from jax import lax
from jax.experimental import pallas as pl
from jax.experimental.pallas import tpu as pltpu


def _round_up(x, m):
    return (x + m - 1) // m * m


def _biaffine_kernel(x1_ref, x2_ref, w_ref, b_ref, o_ref, affine_sc, *,
                     out_feats, l1p):
    # x1_ref:    (1, L1p, D1)     bf16  (block constant over the L2 grid axis)
    # x2_ref:    (1, tL2, D2)     bf16
    # w_ref:     (O, D1, D2)      bf16  (pre-transposed Linear weight)
    # b_ref:     (O, 1, D2)       f32
    # o_ref:     (1, tL2, O*L1p)  f32
    # affine_sc: (O, L1p, D2)     bf16 scratch, persistent across L2 tiles.

    # Linear(input1), computed once per batch element (first L2 tile only).
    @pl.when(pl.program_id(1) == 0)
    def _():
        x1 = x1_ref[0]                                       # [L1p, D1]
        for o in range(out_feats):
            aff = lax.dot_general(
                x1, w_ref[o], (((1,), (0,)), ((), ())),      # [L1p,D1]@[D1,D2]
                preferred_element_type=jnp.float32,
            ) + b_ref[o]                                     # + [1, D2]
            affine_sc[o] = aff.astype(affine_sc.dtype)

    x2 = x2_ref[0]                                           # [tL2, D2]
    for o in range(out_feats):
        # res[j, i] = sum_d x2[j, d] * affine_o[i, d]   (q @ k^T pattern)
        res = lax.dot_general(
            x2, affine_sc[o], (((1,), (1,)), ((), ())),
            preferred_element_type=jnp.float32,
        )                                                    # [tL2, L1p]
        # 128-aligned, lane-dense contiguous store (o * L1p is a multiple of 128).
        o_ref[0, :, pl.ds(o * l1p, l1p)] = res.astype(o_ref.dtype)


def biaffine_forward(input1, input2, weight, bias, out_features):
    """input1: [B, L1, D1], input2: [B, L2, D2],
    weight: [O*D2, D1], bias: [O*D2]  ->  [B, L2, L1, O]"""
    B, L1, D1 = input1.shape
    B2, L2, D2 = input2.shape
    O = out_features
    assert B == B2
    assert weight.shape == (O * D2, D1)
    assert bias.shape == (O * D2,)

    out_dtype = input1.dtype

    # ---- wrapper-side layout work (paid once, outside the kernel) ----------
    L1p = _round_up(L1, 128)                       # lane-dense per-o output chunks
    tL2 = 256 if L2 >= 256 else _round_up(L2, 8)   # L2 tile
    L2p = _round_up(L2, tL2)

    x1 = jnp.pad(input1, ((0, 0), (0, L1p - L1), (0, 0))).astype(jnp.bfloat16)
    x2 = jnp.pad(input2, ((0, 0), (0, L2p - L2), (0, 0))).astype(jnp.bfloat16)
    # W[o*D2+d, k] -> w_t[o, k, d]: first-matmul contraction lands on dim 0 of RHS.
    w_t = jnp.transpose(weight.reshape(O, D2, D1), (0, 2, 1)).astype(jnp.bfloat16)
    b_r = bias.reshape(O, 1, D2).astype(jnp.float32)

    kernel = functools.partial(_biaffine_kernel, out_feats=O, l1p=L1p)
    grid = (B, L2p // tL2)

    # Advisory cost estimate for XLA's scheduler.
    flops = 2 * B * (L1p * O * D2 * D1 + L2p * O * L1p * D2)
    bytes_accessed = int(x1.size * 2 + x2.size * 2 + w_t.size * 2
                         + b_r.size * 4 + B * L2p * O * L1p * 4)

    # VMEM budget: double-buffered blocks + weight/bias + persistent scratch.
    vmem_est = (2 * (L1p * D1 * 2 + tL2 * D2 * 2 + tL2 * O * L1p * 4)
                + 2 * O * D1 * D2 * 2 + 2 * O * D2 * 4
                + O * L1p * D2 * 2)
    cp_kwargs = dict(dimension_semantics=("parallel", "arbitrary"))
    if vmem_est > 32 * 1024 * 1024:
        # TODO(synk): re-derive tL2 / lower this cap for v7x (64 MiB physical VMEM).
        cp_kwargs["vmem_limit_bytes"] = min(int(1.3 * vmem_est), 100 * 1024 * 1024)

    out_flat = pl.pallas_call(
        kernel,
        out_shape=jax.ShapeDtypeStruct((B, L2p, O * L1p), out_dtype),
        grid_spec=pltpu.PrefetchScalarGridSpec(
            num_scalar_prefetch=0,
            grid=grid,
            in_specs=[
                pl.BlockSpec((1, L1p, D1), lambda b, j: (b, 0, 0)),   # input1
                pl.BlockSpec((1, tL2, D2), lambda b, j: (b, j, 0)),   # input2
                pl.BlockSpec((O, D1, D2), lambda b, j: (0, 0, 0)),    # weight
                pl.BlockSpec((O, 1, D2), lambda b, j: (0, 0, 0)),     # bias
            ],
            out_specs=pl.BlockSpec((1, tL2, O * L1p), lambda b, j: (b, j, 0)),
            scratch_shapes=[pltpu.VMEM((O, L1p, D2), jnp.bfloat16)],
        ),
        compiler_params=pltpu.CompilerParams(**cp_kwargs),
        cost_estimate=pl.CostEstimate(
            flops=flops, transcendentals=0, bytes_accessed=bytes_accessed),
    )(x1, x2, w_t, b_r)

    # [B, L2p, O*L1p] -> slice off padding, permute -> [B, L2, L1, O].
    out4 = out_flat.reshape(B, L2p, O, L1p)[:, :L2, :, :L1]
    return jnp.transpose(out4, (0, 1, 3, 2))


def biaffine_ref(input1, input2, weight, bias, out_features):
    """Plain-JAX reference mirroring the PyTorch code line-by-line (f32)."""
    B, L1, D1 = input1.shape
    _, L2, D2 = input2.shape
    O = out_features
    affine = jnp.einsum("bld,od->blo", input1, weight) + bias     # [B, L1, O*D2]
    affine = affine.reshape(B, L1 * O, D2)
    bi = jnp.einsum("bmd,bnd->bmn", affine, input2)               # [B, L1*O, L2]
    bi = jnp.transpose(bi, (0, 2, 1))                             # [B, L2, L1*O]
    return bi.reshape(B, L2, L1, O)


if __name__ == "__main__":
    # Small shapes consistent with the module.
    B, L1, L2 = 2, 8, 8
    in1_features, in2_features, out_features = 32, 32, 4

    key = jax.random.PRNGKey(0)
    k1, k2, k3, k4 = jax.random.split(key, 4)

    input1 = jax.random.normal(k1, (B, L1, in1_features), dtype=jnp.float32)
    input2 = jax.random.normal(k2, (B, L2, in2_features), dtype=jnp.float32)

    # nn.Linear parameter shapes: W [O*D2, D1], b [O*D2].
    weight = 0.1 * jax.random.normal(
        k3, (out_features * in2_features, in1_features), dtype=jnp.float32
    )
    bias = 0.1 * jax.random.normal(
        k4, (out_features * in2_features,), dtype=jnp.float32
    )

    out = biaffine_forward(input1, input2, weight, bias, out_features)
    out = jax.block_until_ready(out)

    ref = biaffine_ref(input1, input2, weight, bias, out_features)
    assert out.shape == (B, L2, L1, out_features)
    # bf16 MXU inputs with f32 accumulation: expect ~1e-2-level deviations
    # vs. the pure-f32 reference.
    err = float(jnp.max(jnp.abs(out - ref)))
    assert err < 2e-1, f"max abs err {err}"
    assert jnp.allclose(out, ref, atol=2e-1, rtol=5e-2)

    print("KERNEL_OK")
</pallas_src>

<mosaic_0001>
module attributes {stable_mosaic.version = 11 : i64} {
  func.func @_biaffine_kernel(%arg0: i32, %arg1: i32, %arg2: memref<1x128x32xbf16, #tpu.memory_space<vmem>>, %arg3: memref<1x8x32xbf16, #tpu.memory_space<vmem>>, %arg4: memref<4x32x32xbf16, #tpu.memory_space<vmem>>, %arg5: memref<4x1x32xf32, #tpu.memory_space<vmem>>, %arg6: memref<1x8x512xf32, #tpu.memory_space<vmem>>, %arg7: memref<4x128x32xbf16, #tpu.memory_space<vmem>>) attributes {dimension_semantics = [#tpu.dimension_semantics<parallel>, #tpu.dimension_semantics<arbitrary>], iteration_bounds = array<i64: 2, 1>, scalar_prefetch = 0 : i64, scratch_operands = 1 : i64, tpu.core_type = #tpu.core_type<tc>, window_params = [{transform_indices = @transform_0, window_bounds = array<i64: 1, 128, 32>}, {transform_indices = @transform_1, window_bounds = array<i64: 1, 8, 32>}, {pipeline_mode = #tpu.pipeline_mode<synchronous>, transform_indices = @transform_2, window_bounds = array<i64: 4, 32, 32>}, {pipeline_mode = #tpu.pipeline_mode<synchronous>, transform_indices = @transform_3, window_bounds = array<i64: 4, 1, 32>}, {transform_indices = @transform_4, window_bounds = array<i64: 1, 8, 512>}]} {
    %c0_i32 = arith.constant 0 : i32
    %0 = arith.cmpi eq, %arg1, %c0_i32 : i32
    %1 = arith.extui %0 : i1 to i32
    %c0_i32_0 = arith.constant 0 : i32
    %2 = arith.cmpi ne, %1, %c0_i32_0 : i32
    scf.if %2 {
      %c0_24 = arith.constant 0 : index
      %c0_25 = arith.constant 0 : index
      %c0_26 = arith.constant 0 : index
      %29 = vector.load %arg2[%c0_24, %c0_25, %c0_26] : memref<1x128x32xbf16, #tpu.memory_space<vmem>>, vector<1x128x32xbf16>
      %30 = vector.shape_cast %29 : vector<1x128x32xbf16> to vector<128x32xbf16>
      %c0_27 = arith.constant 0 : index
      %c0_28 = arith.constant 0 : index
      %c0_29 = arith.constant 0 : index
      %31 = vector.load %arg4[%c0_27, %c0_28, %c0_29] : memref<4x32x32xbf16, #tpu.memory_space<vmem>>, vector<1x32x32xbf16>
      %32 = vector.shape_cast %31 : vector<1x32x32xbf16> to vector<32x32xbf16>
      %cst_30 = arith.constant dense<0.000000e+00> : vector<128x32xf32>
      %33 = tpu.matmul %30, %32, %cst_30 {dimension_numbers = #tpu.dot_dimension_numbers<[1], [0], [0], [1], [0, 0, 1, 1], [], []>} : vector<128x32xbf16>, vector<32x32xbf16>, vector<128x32xf32> -> vector<128x32xf32>
      %c0_31 = arith.constant 0 : index
      %c0_32 = arith.constant 0 : index
      %c0_33 = arith.constant 0 : index
      %34 = vector.load %arg5[%c0_31, %c0_32, %c0_33] : memref<4x1x32xf32, #tpu.memory_space<vmem>>, vector<1x1x32xf32>
      %35 = vector.shape_cast %34 : vector<1x1x32xf32> to vector<1x32xf32>
      %36 = vector.broadcast %35 : vector<1x32xf32> to vector<128x32xf32>
      %37 = arith.addf %33, %36 : vector<128x32xf32>
      %38 = arith.truncf %37 : vector<128x32xf32> to vector<128x32xbf16>
      %c0_34 = arith.constant 0 : index
      %c0_35 = arith.constant 0 : index
      %c0_36 = arith.constant 0 : index
      %39 = vector.load %arg7[%c0_34, %c0_35, %c0_36] : memref<4x128x32xbf16, #tpu.memory_space<vmem>>, vector<1x128x32xbf16>
      %40 = vector.shape_cast %39 : vector<1x128x32xbf16> to vector<128x32xbf16>
      %41 = vector.shape_cast %38 : vector<128x32xbf16> to vector<1x128x32xbf16>
      tpu.vector_store %arg7[%c0_34, %c0_35, %c0_36], %41 {strides = array<i32>} : memref<4x128x32xbf16, #tpu.memory_space<vmem>>, vector<1x128x32xbf16>,
      %c1_37 = arith.constant 1 : index
      %c0_38 = arith.constant 0 : index
      %c0_39 = arith.constant 0 : index
      %42 = vector.load %arg4[%c1_37, %c0_38, %c0_39] : memref<4x32x32xbf16, #tpu.memory_space<vmem>>, vector<1x32x32xbf16>
      %43 = vector.shape_cast %42 : vector<1x32x32xbf16> to vector<32x32xbf16>
      %cst_40 = arith.constant dense<0.000000e+00> : vector<128x32xf32>
      %44 = tpu.matmul %30, %43, %cst_40 {dimension_numbers = #tpu.dot_dimension_numbers<[1], [0], [0], [1], [0, 0, 1, 1], [], []>} : vector<128x32xbf16>, vector<32x32xbf16>, vector<128x32xf32> -> vector<128x32xf32>
      %c1_41 = arith.constant 1 : index
      %c0_42 = arith.constant 0 : index
      %c0_43 = arith.constant 0 : index
      %45 = vector.load %arg5[%c1_41, %c0_42, %c0_43] : memref<4x1x32xf32, #tpu.memory_space<vmem>>, vector<1x1x32xf32>
      %46 = vector.shape_cast %45 : vector<1x1x32xf32> to vector<1x32xf32>
      %47 = vector.broadcast %46 : vector<1x32xf32> to vector<128x32xf32>
      %48 = arith.addf %44, %47 : vector<128x32xf32>
      %49 = arith.truncf %48 : vector<128x32xf32> to vector<128x32xbf16>
      %c1_44 = arith.constant 1 : index
      %c0_45 = arith.constant 0 : index
      %c0_46 = arith.constant 0 : index
      %50 = vector.load %arg7[%c1_44, %c0_45, %c0_46] : memref<4x128x32xbf16, #tpu.memory_space<vmem>>, vector<1x128x32xbf16>
      %51 = vector.shape_cast %50 : vector<1x128x32xbf16> to vector<128x32xbf16>
      %52 = vector.shape_cast %49 : vector<128x32xbf16> to vector<1x128x32xbf16>
      tpu.vector_store %arg7[%c1_44, %c0_45, %c0_46], %52 {strides = array<i32>} : memref<4x128x32xbf16, #tpu.memory_space<vmem>>, vector<1x128x32xbf16>,
      %c2_47 = arith.constant 2 : index
      %c0_48 = arith.constant 0 : index
      %c0_49 = arith.constant 0 : index
      %53 = vector.load %arg4[%c2_47, %c0_48, %c0_49] : memref<4x32x32xbf16, #tpu.memory_space<vmem>>, vector<1x32x32xbf16>
      %54 = vector.shape_cast %53 : vector<1x32x32xbf16> to vector<32x32xbf16>
      %cst_50 = arith.constant dense<0.000000e+00> : vector<128x32xf32>
      %55 = tpu.matmul %30, %54, %cst_50 {dimension_numbers = #tpu.dot_dimension_numbers<[1], [0], [0], [1], [0, 0, 1, 1], [], []>} : vector<128x32xbf16>, vector<32x32xbf16>, vector<128x32xf32> -> vector<128x32xf32>
      %c2_51 = arith.constant 2 : index
      %c0_52 = arith.constant 0 : index
      %c0_53 = arith.constant 0 : index
      %56 = vector.load %arg5[%c2_51, %c0_52, %c0_53] : memref<4x1x32xf32, #tpu.memory_space<vmem>>, vector<1x1x32xf32>
      %57 = vector.shape_cast %56 : vector<1x1x32xf32> to vector<1x32xf32>
      %58 = vector.broadcast %57 : vector<1x32xf32> to vector<128x32xf32>
      %59 = arith.addf %55, %58 : vector<128x32xf32>
      %60 = arith.truncf %59 : vector<128x32xf32> to vector<128x32xbf16>
      %c2_54 = arith.constant 2 : index
      %c0_55 = arith.constant 0 : index
      %c0_56 = arith.constant 0 : index
      %61 = vector.load %arg7[%c2_54, %c0_55, %c0_56] : memref<4x128x32xbf16, #tpu.memory_space<vmem>>, vector<1x128x32xbf16>
      %62 = vector.shape_cast %61 : vector<1x128x32xbf16> to vector<128x32xbf16>
      %63 = vector.shape_cast %60 : vector<128x32xbf16> to vector<1x128x32xbf16>
      tpu.vector_store %arg7[%c2_54, %c0_55, %c0_56], %63 {strides = array<i32>} : memref<4x128x32xbf16, #tpu.memory_space<vmem>>, vector<1x128x32xbf16>,
      %c3_57 = arith.constant 3 : index
      %c0_58 = arith.constant 0 : index
      %c0_59 = arith.constant 0 : index
      %64 = vector.load %arg4[%c3_57, %c0_58, %c0_59] : memref<4x32x32xbf16, #tpu.memory_space<vmem>>, vector<1x32x32xbf16>
      %65 = vector.shape_cast %64 : vector<1x32x32xbf16> to vector<32x32xbf16>
      %cst_60 = arith.constant dense<0.000000e+00> : vector<128x32xf32>
      %66 = tpu.matmul %30, %65, %cst_60 {dimension_numbers = #tpu.dot_dimension_numbers<[1], [0], [0], [1], [0, 0, 1, 1], [], []>} : vector<128x32xbf16>, vector<32x32xbf16>, vector<128x32xf32> -> vector<128x32xf32>
      %c3_61 = arith.constant 3 : index
      %c0_62 = arith.constant 0 : index
      %c0_63 = arith.constant 0 : index
      %67 = vector.load %arg5[%c3_61, %c0_62, %c0_63] : memref<4x1x32xf32, #tpu.memory_space<vmem>>, vector<1x1x32xf32>
      %68 = vector.shape_cast %67 : vector<1x1x32xf32> to vector<1x32xf32>
      %69 = vector.broadcast %68 : vector<1x32xf32> to vector<128x32xf32>
      %70 = arith.addf %66, %69 : vector<128x32xf32>
      %71 = arith.truncf %70 : vector<128x32xf32> to vector<128x32xbf16>
      %c3_64 = arith.constant 3 : index
      %c0_65 = arith.constant 0 : index
      %c0_66 = arith.constant 0 : index
      %72 = vector.load %arg7[%c3_64, %c0_65, %c0_66] : memref<4x128x32xbf16, #tpu.memory_space<vmem>>, vector<1x128x32xbf16>
      %73 = vector.shape_cast %72 : vector<1x128x32xbf16> to vector<128x32xbf16>
      %74 = vector.shape_cast %71 : vector<128x32xbf16> to vector<1x128x32xbf16>
      tpu.vector_store %arg7[%c3_64, %c0_65, %c0_66], %74 {strides = array<i32>} : memref<4x128x32xbf16, #tpu.memory_space<vmem>>, vector<1x128x32xbf16>,
    } else {
    }
    %c0 = arith.constant 0 : index
    %c0_1 = arith.constant 0 : index
    %c0_2 = arith.constant 0 : index
    %3 = vector.load %arg3[%c0, %c0_1, %c0_2] : memref<1x8x32xbf16, #tpu.memory_space<vmem>>, vector<1x8x32xbf16>
    %4 = vector.shape_cast %3 : vector<1x8x32xbf16> to vector<8x32xbf16>
    %c0_3 = arith.constant 0 : index
    %c0_4 = arith.constant 0 : index
    %c0_5 = arith.constant 0 : index
    %5 = vector.load %arg7[%c0_3, %c0_4, %c0_5] : memref<4x128x32xbf16, #tpu.memory_space<vmem>>, vector<1x128x32xbf16>
    %6 = vector.shape_cast %5 : vector<1x128x32xbf16> to vector<128x32xbf16>
    %cst = arith.constant dense<0.000000e+00> : vector<8x128xf32>
    %7 = tpu.matmul %4, %6, %cst {dimension_numbers = #tpu.dot_dimension_numbers<[1], [1], [0], [0], [0, 0, 1, 0], [], []>} : vector<8x32xbf16>, vector<128x32xbf16>, vector<8x128xf32> -> vector<8x128xf32>
    %c0_6 = arith.constant 0 : index
    %c0_7 = arith.constant 0 : index
    %c0_8 = arith.constant 0 : index
    %8 = vector.load %arg6[%c0_6, %c0_7, %c0_8] : memref<1x8x512xf32, #tpu.memory_space<vmem>>, vector<1x8x128xf32>
    %9 = vector.shape_cast %8 : vector<1x8x128xf32> to vector<8x128xf32>
    %10 = vector.shape_cast %7 : vector<8x128xf32> to vector<1x8x128xf32>
    tpu.vector_store %arg6[%c0_6, %c0_7, %c0_8], %10 {strides = array<i32>} : memref<1x8x512xf32, #tpu.memory_space<vmem>>, vector<1x8x128xf32>,
    %c1 = arith.constant 1 : index
    %c0_9 = arith.constant 0 : index
    %c0_10 = arith.constant 0 : index
    %11 = vector.load %arg7[%c1, %c0_9, %c0_10] : memref<4x128x32xbf16, #tpu.memory_space<vmem>>, vector<1x128x32xbf16>
    %12 = vector.shape_cast %11 : vector<1x128x32xbf16> to vector<128x32xbf16>
    %cst_11 = arith.constant dense<0.000000e+00> : vector<8x128xf32>
    %13 = tpu.matmul %4, %12, %cst_11 {dimension_numbers = #tpu.dot_dimension_numbers<[1], [1], [0], [0], [0, 0, 1, 0], [], []>} : vector<8x32xbf16>, vector<128x32xbf16>, vector<8x128xf32> -> vector<8x128xf32>
    %c0_12 = arith.constant 0 : index
    %c0_13 = arith.constant 0 : index
    %c128 = arith.constant 128 : index
    %14 = vector.load %arg6[%c0_12, %c0_13, %c128] : memref<1x8x512xf32, #tpu.memory_space<vmem>>, vector<1x8x128xf32>
    %15 = vector.shape_cast %14 : vector<1x8x128xf32> to vector<8x128xf32>
    %16 = vector.shape_cast %13 : vector<8x128xf32> to vector<1x8x128xf32>
    tpu.vector_store %arg6[%c0_12, %c0_13, %c128], %16 {strides = array<i32>} : memref<1x8x512xf32, #tpu.memory_space<vmem>>, vector<1x8x128xf32>,
    %c2 = arith.constant 2 : index
    %c0_14 = arith.constant 0 : index
    %c0_15 = arith.constant 0 : index
    %17 = vector.load %arg7[%c2, %c0_14, %c0_15] : memref<4x128x32xbf16, #tpu.memory_space<vmem>>, vector<1x128x32xbf16>
    %18 = vector.shape_cast %17 : vector<1x128x32xbf16> to vector<128x32xbf16>
    %cst_16 = arith.constant dense<0.000000e+00> : vector<8x128xf32>
    %19 = tpu.matmul %4, %18, %cst_16 {dimension_numbers = #tpu.dot_dimension_numbers<[1], [1], [0], [0], [0, 0, 1, 0], [], []>} : vector<8x32xbf16>, vector<128x32xbf16>, vector<8x128xf32> -> vector<8x128xf32>
    %c0_17 = arith.constant 0 : index
    %c0_18 = arith.constant 0 : index
    %c256 = arith.constant 256 : index
    %20 = vector.load %arg6[%c0_17, %c0_18, %c256] : memref<1x8x512xf32, #tpu.memory_space<vmem>>, vector<1x8x128xf32>
    %21 = vector.shape_cast %20 : vector<1x8x128xf32> to vector<8x128xf32>
    %22 = vector.shape_cast %19 : vector<8x128xf32> to vector<1x8x128xf32>
    tpu.vector_store %arg6[%c0_17, %c0_18, %c256], %22 {strides = array<i32>} : memref<1x8x512xf32, #tpu.memory_space<vmem>>, vector<1x8x128xf32>,
    %c3 = arith.constant 3 : index
    %c0_19 = arith.constant 0 : index
    %c0_20 = arith.constant 0 : index
    %23 = vector.load %arg7[%c3, %c0_19, %c0_20] : memref<4x128x32xbf16, #tpu.memory_space<vmem>>, vector<1x128x32xbf16>
    %24 = vector.shape_cast %23 : vector<1x128x32xbf16> to vector<128x32xbf16>
    %cst_21 = arith.constant dense<0.000000e+00> : vector<8x128xf32>
    %25 = tpu.matmul %4, %24, %cst_21 {dimension_numbers = #tpu.dot_dimension_numbers<[1], [1], [0], [0], [0, 0, 1, 0], [], []>} : vector<8x32xbf16>, vector<128x32xbf16>, vector<8x128xf32> -> vector<8x128xf32>
    %c0_22 = arith.constant 0 : index
    %c0_23 = arith.constant 0 : index
    %c384 = arith.constant 384 : index
    %26 = vector.load %arg6[%c0_22, %c0_23, %c384] : memref<1x8x512xf32, #tpu.memory_space<vmem>>, vector<1x8x128xf32>
    %27 = vector.shape_cast %26 : vector<1x8x128xf32> to vector<8x128xf32>
    %28 = vector.shape_cast %25 : vector<8x128xf32> to vector<1x8x128xf32>
    tpu.vector_store %arg6[%c0_22, %c0_23, %c384], %28 {strides = array<i32>} : memref<1x8x512xf32, #tpu.memory_space<vmem>>, vector<1x8x128xf32>,
    return
  }
  func.func @transform_0(%arg0: i32, %arg1: i32) -> (i32, i32, i32) {
    %c0_i32 = arith.constant 0 : i32
    %c0_i32_0 = arith.constant 0 : i32
    %c0_i32_1 = arith.constant 0 : i32
    return %arg0, %c0_i32, %c0_i32_0 : i32, i32, i32
  }
  func.func @transform_1(%arg0: i32, %arg1: i32) -> (i32, i32, i32) {
    %c0_i32 = arith.constant 0 : i32
    %c0_i32_0 = arith.constant 0 : i32
    return %arg0, %arg1, %c0_i32 : i32, i32, i32
  }
  func.func @transform_2(%arg0: i32, %arg1: i32) -> (i32, i32, i32) {
    %c0_i32 = arith.constant 0 : i32
    %c0_i32_0 = arith.constant 0 : i32
    %c0_i32_1 = arith.constant 0 : i32
    %c0_i32_2 = arith.constant 0 : i32
    return %c0_i32, %c0_i32_0, %c0_i32_1 : i32, i32, i32
  }
  func.func @transform_3(%arg0: i32, %arg1: i32) -> (i32, i32, i32) {
    %c0_i32 = arith.constant 0 : i32
    %c0_i32_0 = arith.constant 0 : i32
    %c0_i32_1 = arith.constant 0 : i32
    %c0_i32_2 = arith.constant 0 : i32
    return %c0_i32, %c0_i32_0, %c0_i32_1 : i32, i32, i32
  }
  func.func @transform_4(%arg0: i32, %arg1: i32) -> (i32, i32, i32) {
    %c0_i32 = arith.constant 0 : i32
    %c0_i32_0 = arith.constant 0 : i32
    return %arg0, %arg1, %c0_i32 : i32, i32, i32
  }
}

</mosaic_0001>

<bundles_post_ra>
// kernel: tpu_custom_call.1
= control target key start
LH: loop header
LB: loop body
LE: loop exit
PB: predicated region body
PF: predicated region fallthrough
CT: control target
= control target key end

     0   :  { %9 = vsyncpa [#allocation4], 0  ;;  %s2166_s0 = inlined_call_operand.vmem [shape: bf16[2,128,32], index: 0, kind: input, shape index: {}]   ;;  %s2167_s1 = inlined_call_operand.vmem [shape: bf16[2,8,32], index: 1, kind: input, shape index: {}]   ;;  %s2168_s2 = inlined_call_operand.vmem [shape: bf16[4,32,32], index: 2, kind: input, shape index: {}]   ;;  %s2169_s3 = inlined_call_operand.vmem [shape: f32[4,1,32], index: 3, kind: input, shape index: {}]   ;;  %s2170_s4 = inlined_call_operand.hbm [shape: f32[2,8,512], index: 4, kind: output, shape index: {}]  }
   0x1   :  { %11 = vsyncpa [#allocation4 + $0x1], 0  ;;  %s1783_s15 = smov 0   ;;  %s1785_s16 = smov 0  }
   0x2   :  { %s1787_s17 = smov 0   ;;  %s1789_s18 = smov 0  }
   0x3   :  { %s1791_s19 = smov 0   ;;  %s1793_s20 = smov 0  }
   0x4 LB: > { %s1279_s21 = sadd.s32 4294967295, %s1753_s20   ;;  %s1280_s22 = sadd.s32 4294967294, %s1753_s20   ;;  %s1753_s20 = sphi %s1793_s20, %s17_s20   ;;  %s1749_s19 = sphi %s1791_s19, %s2177_s19   ;;  %s1745_s18 = sphi %s1789_s18, %s2176_s18   ;;  %s1741_s17 = sphi %s1787_s17, %s2175_s17   ;;  %s1737_s16 = sphi %s1785_s16, %s2174_s16   ;;  %s1733_s15 = sphi %s1783_s15, %s2173_s15  }
   0x5   : > { %s29_s23 = sadd.s32 1, %s1749_s19  ;;  %s134_s24 = sadd.s32 1, %s1741_s17 }
   0x6   : > { %p31_p0 = scmp.ge.s32.totalorder %s29_s23, 2  ;;  %p144_p1 = scmp.ne.s32.totalorder %s1741_s17, %s1737_s16 }
   0x7   : > { %p145_p2 = scmp.eq.s32.totalorder %s1279_s21, 1  ;;  %p150_p3 = scmp.ne.s32.totalorder %s1737_s16, %s1733_s15 }
   0x8   : > { %s2179_s23 = smov (%p31_p0, %s29_s23), 0  ;;  %p151_p5 = scmp.eq.s32.totalorder %s1280_s22, 1 }
   0x9   : > { %p1823_p4 = por %p145_p2, %p144_p1  ;;  %s129_s26 = ssub.s32 %s1749_s19, %s2179_s23 }
   0xa   : > { %p1283_p6 = scmp.ge.s32.totalorder %s1753_s20, 1  ;;  %p132_p7 = scmp.eq.s32.totalorder %s129_s26, 0 }
   0xb   : > { %p1830_p8 = por %p151_p5, %p150_p3  ;;  %p193_p9 = scmp.lt.s32.totalorder %s1753_s20, 3 }
   0xc   : > { %s1836_s28 = scalar_select %p132_p7, %s1741_s17, %s134_s24  }
   0xd   : > { %p194_p10 = pnand %p1283_p6, %p193_p9 }
   0xe   : > { %v1659_v0 = vld [vmem:[%s2168_s2] sm:$0xff] (!%p194_p10)   ;;  %p226_p11 = scmp.lt.s32.totalorder (!%p194_p10), %s1745_s18, 1  ;;  %v1660_v1 = vld [vmem:[%s2168_s2 + $0x10] sm:$0xff] (!%p194_p10)   ;;  %v1661_v2 = vld [vmem:[%s2168_s2 + $0x8] sm:$0xff] (!%p194_p10)   ;;  %vm322_vm0 = vcmask (!%p194_p10), 261120   ;;  %v1755_v16 = vmov (!%p194_p10), 0.0  }
   0xf   : > { %197 = sbr.rel (%p194_p10) target bundleno = 611 (0x263), region = 36  ;;  %1442 = vmatprep.subr.bf16.mxu0 (!%p194_p10), %v1659_v0  ;;  %1462 = vmatprep.subr.bf16.mxu1 (!%p194_p10), %v1660_v1  ;;  %v1662_v3 = vld [vmem:[%s2168_s2 + $0x18] sm:$0xff] (!%p194_p10)   ;;  %v1669_v4 = vld [vmem:[%s2168_s2 + $0x20] sm:$0xff] (!%p194_p10)   ;;  %v1670_v5 = vld [vmem:[%s2168_s2 + $0x30] sm:$0xff] (!%p194_p10)   ;;  %vm1756_vm1 = vmmov (!%p194_p10), 0   ;;  %s1365_s7 = sshll.u32 (!%p194_p10), %s1745_s18, 9 }
  0x10   : > { %1443 = vmatpush3.bf16.msra.mxu0 (!%p194_p10), %v1659_v0  ;;  %1463 = vmatpush3.bf16.msra.mxu1 (!%p194_p10), %v1660_v1  ;;  %v1673_v11 = vld [vmem:[%s2168_s2 + $0x28] sm:$0xff] (!%p194_p10)   ;;  %v1674_v12 = vld [vmem:[%s2168_s2 + $0x38] sm:$0xff] (!%p194_p10)   ;;  %v1921_v18 = vld [vmem:[%s2169_s3] ss:$0 sm:$0xff] (!%p194_p10)  ;;  %s1757_s14 = smov (!%p194_p10), [#allocation3]  }
  0x11   : > { %1444 = vmatprep.subr.bf16.mxu0 (!%p194_p10), %v1661_v2  ;;  %1464 = vmatprep.subr.bf16.mxu1 (!%p194_p10), %v1662_v3  ;;  %v1926_v20 = vld [vmem:[%s2169_s3 + $0x1] ss:$0 sm:$0xff] (!%p194_p10)  ;;  %s1679_s21 = sshll.u32 (!%p194_p10), %s1757_s14, 4  ;;  %s1680_s21 = int_to_ptr.vmem [resolvable:$false] %s1679_s21 }
  0x12   : > { %s1681_s22 = scalar_lea.vmem (!%p194_p10), %s1680_s21, 1024 }
  0x14   : > { %1445 = vmatpush3.bf16.msra.mxu0 (!%p194_p10), %v1661_v2  ;;  %1465 = vmatpush3.bf16.msra.mxu1 (!%p194_p10), %v1662_v3 }
  0x15   : > { %1482 = vmatprep.subr.bf16.mxu0 (!%p194_p10), %v1669_v4  ;;  %1502 = vmatprep.subr.bf16.mxu1 (!%p194_p10), %v1670_v5 }
  0x16   : > { %s1849_s9 = scalar_select %p226_p11, %s1745_s18, 1 }
  0x18   : > { %s1364_s12 = sshll.u32 %s1849_s9, 6 }
  0x19   : > { %s1861_s24 = scalar_lea.vmem %s2166_s0, %s1364_s12  ;;  %s2119_s12 = scalar_lea.hbm %s2170_s4, %s1365_s7 }
  0x1a   : > { %v1663_v6 = vld [vmem:[%s1861_s24] sm:$0xff]   ;;  %v1664_v7 = vld [vmem:[%s1861_s24 + $0x8] sm:$0xff]   ;;  %v1665_v8 = vld [vmem:[%s1861_s24 + $0x10] sm:$0xff]  }
  0x1b   : > { %1446 = vmatprep.mubr.msk.bf16.mxu0 %vm322_vm0, %v1663_v6  ;;  %1466 = vmatprep.mubr.msk.bf16.mxu1 %vm322_vm0, %v1663_v6  ;;  %v1666_v9 = vld [vmem:[%s1861_s24 + $0x18] sm:$0xff]   ;;  %v1667_v10 = vld [vmem:[%s1861_s24 + $0x20] sm:$0xff]   ;;  %v1668_v13 = vld [vmem:[%s1861_s24 + $0x28] sm:$0xff]  }
  0x1c   : > { %1447 = vmatmul.mubr.msk.bf16.vlgmr.msra.gmra.mrb[0].mxu0 %vm322_vm0, %v1664_v7  ;;  %1467 = vmatmul.mubr.msk.bf16.vlgmr.msra.gmra.mrb[0].mxu1 %vm322_vm0, %v1664_v7  ;;  %v1671_v14 = vld [vmem:[%s1861_s24 + $0x30] sm:$0xff]   ;;  %v1672_v15 = vld [vmem:[%s1861_s24 + $0x38] sm:$0xff]   ;;  %s1287_s24 = sshll.u32 %s1849_s9, 2  ;;  %s223_s9 = sand.u32 1, %s1737_s16  }
  0x1d   : > { %1450 = vmatprep.mubr.msk.bf16.mxu0 %vm322_vm0, %v1665_v8  ;;  %1470 = vmatprep.mubr.msk.bf16.mxu1 %vm322_vm0, %v1665_v8  ;;  %s237_s30 = scalar_lea.vmem %s2167_s1, %s1287_s24  ;;  %s1284_s5 = sshll.u32 %s223_s9, 5 }
  0x1e   : > { %1483 = vmatpush3.bf16.msra.mxu0 %v1669_v4  ;;  %1503 = vmatpush3.bf16.msra.mxu1 %v1670_v5  ;;  %s225_s6 = scalar_lea.vmem [#allocation3], %s1284_s5  ;;  %s1178_s18 = scalar_lea.sflag [#allocation4], %s223_s9 }
  0x1f   : > { %1484 = vmatprep.subr.bf16.mxu0 %v1673_v11  ;;  %1504 = vmatprep.subr.bf16.mxu1 %v1674_v12  ;;  %s1194_s8 = sshll.u32 %s225_s6, 4  ;;  %s2121_s8 = int_to_ptr.vmem [resolvable:$true] %s1194_s8 }
  0x20   : > { %s1675_s13 = scalar_lea.vmem %s2121_s8, 512  ;;  %p1682_p1 = scmp.lt.s32.totalorder %s2121_s8, %s1680_s21 }
  0x21   : > { %p1676_p12 = scmp.ne.s32.totalorder %s2121_s8, %s1675_s13  ;;  %p1683_p2 = scmp.lt.s32.totalorder %s1681_s22, %s1675_s13 }
  0x22   : > { %1485 = vmatpush3.bf16.msra.mxu0 %v1673_v11  ;;  %1505 = vmatpush3.bf16.msra.mxu1 %v1674_v12 }
  0x23   : > { %1522 = vmatprep.subr.bf16.mxu0 %v1755_v16  ;;  %1542 = vmatprep.subr.bf16.mxu1 %v1755_v16  ;;  %p1677_p13 = pnand %p1676_p12, %p1823_p4  ;;  %p1684_p3 = por %p1683_p2, %p1682_p1 }
  0x24   : > { %1451 = vmatmul.mubr.msk.bf16.gmra.mrb[4].mxu0 %vm322_vm0, %v1666_v9  ;;  %1471 = vmatmul.mubr.msk.bf16.gmra.mrb[4].mxu1 %vm322_vm0, %v1666_v9 }
  0x25   : > { %1454 = vmatprep.mubr.msk.bf16.mxu0 %vm322_vm0, %v1667_v10  ;;  %1474 = vmatprep.mubr.msk.bf16.mxu1 %vm322_vm0, %v1667_v10  ;;  %p1678_p0 = pneg %p1677_p13 }
  0x27   : > { %p1685_p5 = pnand %p1684_p3, %p1678_p0 }
  0x2c   : > { %1455 = vmatmul.mubr.msk.bf16.gmra.mrb[8].mxu0 %vm322_vm0, %v1668_v13  ;;  %1475 = vmatmul.mubr.msk.bf16.gmra.mrb[8].mxu1 %vm322_vm0, %v1668_v13 }
  0x2d   : > { %1458 = vmatprep.mubr.msk.bf16.mxu0 %vm322_vm0, %v1671_v14  ;;  %1478 = vmatprep.mubr.msk.bf16.mxu1 %vm322_vm0, %v1671_v14 }
  0x34   : > { %1459 = vmatmul.mubr.msk.bf16.gmra.mrb[12].mxu0 %vm322_vm0, %v1672_v15  ;;  %1479 = vmatmul.mubr.msk.bf16.gmra.mrb[12].mxu1 %vm322_vm0, %v1672_v15 }
  0x35   : > { %1486 = vmatprep.mubr.msk.bf16.mxu0 %vm322_vm0, %v1663_v6  ;;  %1506 = vmatprep.mubr.msk.bf16.mxu1 %vm322_vm0, %v1663_v6 }
  0x3c   : > { %1487 = vmatmul.mubr.msk.bf16.vlgmr.msra.gmra.mrb[16].mxu0 %vm322_vm0, %v1664_v7  ;;  %1507 = vmatmul.mubr.msk.bf16.vlgmr.msra.gmra.mrb[16].mxu1 %vm322_vm0, %v1664_v7 }
  0x3d   : > { %1490 = vmatprep.mubr.msk.bf16.mxu0 %vm322_vm0, %v1665_v8  ;;  %1510 = vmatprep.mubr.msk.bf16.mxu1 %vm322_vm0, %v1665_v8 }
  0x44   : > { %1491 = vmatmul.mubr.msk.bf16.gmra.mrb[20].mxu0 %vm322_vm0, %v1666_v9  ;;  %1511 = vmatmul.mubr.msk.bf16.gmra.mrb[20].mxu1 %vm322_vm0, %v1666_v9 }
  0x45   : > { %1494 = vmatprep.mubr.msk.bf16.mxu0 %vm322_vm0, %v1667_v10  ;;  %1514 = vmatprep.mubr.msk.bf16.mxu1 %vm322_vm0, %v1667_v10 }
  0x4c   : > { %1495 = vmatmul.mubr.msk.bf16.gmra.mrb[24].mxu0 %vm322_vm0, %v1668_v13  ;;  %1515 = vmatmul.mubr.msk.bf16.gmra.mrb[24].mxu1 %vm322_vm0, %v1668_v13 }
  0x4d   : > { %1498 = vmatprep.mubr.msk.bf16.mxu0 %vm322_vm0, %v1671_v14  ;;  %1518 = vmatprep.mubr.msk.bf16.mxu1 %vm322_vm0, %v1671_v14 }
  0x54   : > { %1499 = vmatmul.mubr.msk.bf16.gmra.mrb[28].mxu0 %vm322_vm0, %v1672_v15  ;;  %1519 = vmatmul.mubr.msk.bf16.gmra.mrb[28].mxu1 %vm322_vm0, %v1672_v15 }
  0x55   : > { %1538 = vmatprep.mubr.msk.bf16.mxu0 %vm1756_vm1, %v1755_v16  ;;  %1558 = vmatprep.mubr.msk.bf16.mxu1 %vm1756_vm1, %v1755_v16 }
  0xef   : > { %v1448_v17 = vpop.f32.mrb[0].mxu0  ;;  %v1468_v19 = vpop.f32.mrb[0].mxu1 }
  0xf0   : > { %v381_v21 = vpop.f32.mrb[1].mxu0  ;;  %v519_v22 = vpop.f32.mrb[1].mxu1  ;;  %v390_v24 = vadd.f32 %v1448_v17, %v1921_v18  ;;  %v528_v28 = vadd.f32 %v1468_v19, %v1926_v20 }
  0xf1   : > { %v1449_v23 = vpop.f32.mrb[2].mxu0  ;;  %v1469_v26 = vpop.f32.mrb[2].mxu1  ;;  %v382_v29 = vadd.f32 %v1921_v18, %v381_v21  ;;  %v520_v33 = vadd.f32 %v1926_v20, %v519_v22 }
  0xf2   : > { %v393_v25 = vadd.f32 %v1449_v23, %v1921_v18  ;;  %v384_v27 = vpop.f32.mrb[3].mxu0  ;;  %v531_v30 = vadd.f32 %v1469_v26, %v1926_v20  ;;  %v522_v32 = vpop.f32.mrb[3].mxu1 }
  0xf3   : > { %v385_v31 = vadd.f32 %v1921_v18, %v384_v27  ;;  %v523_v35 = vadd.f32 %v1926_v20, %v522_v32 }
  0xf4   : > { %v445_v34 = vpack.c.bf16 %v393_v25, %v390_v24  ;;  %v583_v36 = vpack.c.bf16 %v531_v30, %v528_v28 }
  0xf5   : > { %v444_v37 = vpack.c.bf16 %v385_v31, %v382_v29  ;;  %v582_v38 = vpack.c.bf16 %v523_v35, %v520_v33 }
  0xf6   : > { %453 = vst.msk [vmem:[#allocation2 + $0x8] sm:$0xff] %vm322_vm0, %v445_v34  ;;  %592 = vst.msk [vmem:[#allocation2 + $0x48] sm:$0xff] %vm322_vm0, %v583_v36 }
  0xf7   : > { %452 = vst.msk [vmem:[#allocation2] sm:$0xff] %vm322_vm0, %v444_v37  ;;  %v1452_v39 = vpop.f32.mrb[4].mxu0  ;;  %591 = vst.msk [vmem:[#allocation2 + $0x40] sm:$0xff] %vm322_vm0, %v582_v38  ;;  %v1472_v41 = vpop.f32.mrb[4].mxu1 }
  0xf8   : > { %v406_v40 = vadd.f32 %v1452_v39, %v1921_v18  ;;  %v397_v42 = vpop.f32.mrb[5].mxu0  ;;  %v544_v43 = vadd.f32 %v1472_v41, %v1926_v20  ;;  %v535_v45 = vpop.f32.mrb[5].mxu1 }
  0xf9   : > { %v398_v44 = vadd.f32 %v1921_v18, %v397_v42  ;;  %v1453_v46 = vpop.f32.mrb[6].mxu0  ;;  %v536_v47 = vadd.f32 %v1926_v20, %v535_v45  ;;  %v1473_v49 = vpop.f32.mrb[6].mxu1 }
  0xfa   : > { %v409_v48 = vadd.f32 %v1453_v46, %v1921_v18  ;;  %v400_v50 = vpop.f32.mrb[7].mxu0  ;;  %v547_v51 = vadd.f32 %v1473_v49, %v1926_v20  ;;  %v538_v53 = vpop.f32.mrb[7].mxu1 }
  0xfb   : > { %v401_v52 = vadd.f32 %v1921_v18, %v400_v50  ;;  %v539_v55 = vadd.f32 %v1926_v20, %v538_v53 }
  0xfc   : > { %v447_v54 = vpack.c.bf16 %v409_v48, %v406_v40  ;;  %v585_v56 = vpack.c.bf16 %v547_v51, %v544_v43 }
  0xfd   : > { %v446_v57 = vpack.c.bf16 %v401_v52, %v398_v44  ;;  %v584_v58 = vpack.c.bf16 %v539_v55, %v536_v47  ;;  %v879_v14 = vld [vmem:[#allocation2 + $0x8] sm:$0xff]  ;;  %v1983_v47 = vld [vmem:[%s2169_s3 + $0x2] ss:$0 sm:$0xff] }
  0xfe   : > { %455 = vst.msk [vmem:[#allocation2 + $0x18] sm:$0xff] %vm322_vm0, %v447_v54  ;;  %v878_v59 = vld [vmem:[#allocation2] sm:$0xff]  ;;  %594 = vst.msk [vmem:[#allocation2 + $0x58] sm:$0xff] %vm322_vm0, %v585_v56  ;;  %v957_v19 = vld [vmem:[#allocation2 + $0x48] sm:$0xff]  ;;  %v894_v24 = vsel %vm322_vm0, %v879_v14, 0 }
  0xff   : > { %454 = vst.msk [vmem:[#allocation2 + $0x10] sm:$0xff] %vm322_vm0, %v446_v57  ;;  %v891_v60 = vsel %vm322_vm0, %v878_v59, 0  ;;  %v956_v61 = vld [vmem:[#allocation2 + $0x40] sm:$0xff]  ;;  %v1456_v62 = vpop.f32.mrb[8].mxu0  ;;  %593 = vst.msk [vmem:[#allocation2 + $0x50] sm:$0xff] %vm322_vm0, %v584_v58  ;;  %v1476_v1 = vpop.f32.mrb[8].mxu1 }
 0x100   : > { %1523 = vmatpush3.bf16.xpose.msra.mxu0 %v891_v60  ;;  %v965_v63 = vsel %vm322_vm0, %v956_v61, 0  ;;  %v422_v0 = vadd.f32 %v1456_v62, %v1921_v18  ;;  %v413_v2 = vpop.f32.mrb[9].mxu0  ;;  %v560_v3 = vadd.f32 %v1476_v1, %v1926_v20  ;;  %v551_v5 = vpop.f32.mrb[9].mxu1  ;;  %v968_v26 = vsel %vm322_vm0, %v957_v19, 0 }
 0x101   : > { %1543 = vmatpush3.bf16.xpose.msra.mxu1 %v965_v63  ;;  %1524 = vmatprep.subr.bf16.mxu0 %v1755_v16  ;;  %v414_v4 = vadd.f32 %v1921_v18, %v413_v2  ;;  %v1457_v6 = vpop.f32.mrb[10].mxu0  ;;  %v552_v7 = vadd.f32 %v1926_v20, %v551_v5  ;;  %v1477_v9 = vpop.f32.mrb[10].mxu1 }
 0x102   : > { %1544 = vmatprep.subr.bf16.mxu1 %v1755_v16  ;;  %v425_v8 = vadd.f32 %v1457_v6, %v1921_v18  ;;  %v416_v10 = vpop.f32.mrb[11].mxu0  ;;  %v563_v11 = vadd.f32 %v1477_v9, %v1926_v20  ;;  %v554_v13 = vpop.f32.mrb[11].mxu1 }
 0x103   : > { %v417_v12 = vadd.f32 %v1921_v18, %v416_v10  ;;  %v555_v17 = vadd.f32 %v1926_v20, %v554_v13 }
 0x104   : > { %v449_v15 = vpack.c.bf16 %v425_v8, %v422_v0  ;;  %v587_v21 = vpack.c.bf16 %v563_v11, %v560_v3 }
 0x105   : > { %v448_v22 = vpack.c.bf16 %v417_v12, %v414_v4  ;;  %v586_v23 = vpack.c.bf16 %v555_v17, %v552_v7  ;;  %v881_v1 = vld [vmem:[#allocation2 + $0x18] sm:$0xff] }
 0x106   : > { %457 = vst.msk [vmem:[#allocation2 + $0x28] sm:$0xff] %vm322_vm0, %v449_v15  ;;  %596 = vst.msk [vmem:[#allocation2 + $0x68] sm:$0xff] %vm322_vm0, %v587_v21  ;;  %v880_v41 = vld [vmem:[#allocation2 + $0x10] sm:$0xff]  ;;  %v959_v4 = vld [vmem:[#allocation2 + $0x58] sm:$0xff]  ;;  %v900_v8 = vsel %vm322_vm0, %v881_v1, 0 }
 0x107   : > { %456 = vst.msk [vmem:[#allocation2 + $0x20] sm:$0xff] %vm322_vm0, %v448_v22  ;;  %v1460_v25 = vpop.f32.mrb[12].mxu0  ;;  %595 = vst.msk [vmem:[#allocation2 + $0x60] sm:$0xff] %vm322_vm0, %v586_v23  ;;  %v1480_v28 = vpop.f32.mrb[12].mxu1  ;;  %v958_v44 = vld [vmem:[#allocation2 + $0x50] sm:$0xff]  ;;  %v897_v49 = vsel %vm322_vm0, %v880_v41, 0 }
 0x108   : > { %1525 = vmatpush3.bf16.xpose.msra.mxu0 %v894_v24  ;;  %v438_v27 = vadd.f32 %v1460_v25, %v1921_v18  ;;  %v429_v29 = vpop.f32.mrb[13].mxu0  ;;  %v576_v30 = vadd.f32 %v1480_v28, %v1926_v20  ;;  %v567_v32 = vpop.f32.mrb[13].mxu1  ;;  %v971_v50 = vsel %vm322_vm0, %v958_v44, 0  ;;  %v974_v10 = vsel %vm322_vm0, %v959_v4, 0 }
 0x109   : > { %1545 = vmatpush3.bf16.xpose.msra.mxu1 %v968_v26  ;;  %1526 = vmatprep.subr.bf16.mxu0 %v1755_v16  ;;  %v430_v31 = vadd.f32 %v1921_v18, %v429_v29  ;;  %v1461_v33 = vpop.f32.mrb[14].mxu0  ;;  %v568_v34 = vadd.f32 %v1926_v20, %v567_v32  ;;  %v1481_v36 = vpop.f32.mrb[14].mxu1 }
 0x10a   : > { %1546 = vmatprep.subr.bf16.mxu1 %v1755_v16  ;;  %v441_v35 = vadd.f32 %v1461_v33, %v1921_v18  ;;  %v432_v37 = vpop.f32.mrb[15].mxu0  ;;  %v579_v38 = vadd.f32 %v1481_v36, %v1926_v20  ;;  %v570_v40 = vpop.f32.mrb[15].mxu1 }
 0x10b   : > { %v433_v39 = vadd.f32 %v1921_v18, %v432_v37  ;;  %v571_v43 = vadd.f32 %v1926_v20, %v570_v40  ;;  %v1989_v18 = vld [vmem:[%s2169_s3 + $0x3] ss:$0 sm:$0xff] }
 0x10c   : > { %v451_v42 = vpack.c.bf16 %v441_v35, %v438_v27  ;;  %v589_v45 = vpack.c.bf16 %v579_v38, %v576_v30 }
 0x10d   : > { %v450_v46 = vpack.c.bf16 %v433_v39, %v430_v31  ;;  %v588_v48 = vpack.c.bf16 %v571_v43, %v568_v34 }
 0x10e   : > { %459 = vst.msk [vmem:[#allocation2 + $0x38] sm:$0xff] %vm322_vm0, %v451_v42  ;;  %598 = vst.msk [vmem:[#allocation2 + $0x78] sm:$0xff] %vm322_vm0, %v589_v45  ;;  %v882_v28 = vld [vmem:[#allocation2 + $0x20] sm:$0xff] }
 0x10f   : > { %458 = vst.msk [vmem:[#allocation2 + $0x30] sm:$0xff] %vm322_vm0, %v450_v46  ;;  %v1488_v20 = vpop.f32.mrb[16].mxu0  ;;  %597 = vst.msk [vmem:[#allocation2 + $0x70] sm:$0xff] %vm322_vm0, %v588_v48  ;;  %v1508_v52 = vpop.f32.mrb[16].mxu1  ;;  %v960_v31 = vld [vmem:[#allocation2 + $0x60] sm:$0xff]  ;;  %v903_v35 = vsel %vm322_vm0, %v882_v28, 0 }
 0x110   : > { %1527 = vmatpush3.bf16.xpose.msra.mxu0 %v897_v49  ;;  %v667_v51 = vadd.f32 %v1488_v20, %v1983_v47  ;;  %v658_v53 = vpop.f32.mrb[17].mxu0  ;;  %v806_v54 = vadd.f32 %v1508_v52, %v1989_v18  ;;  %v797_v56 = vpop.f32.mrb[17].mxu1  ;;  %v977_v37 = vsel %vm322_vm0, %v960_v31, 0  ;;  %v883_v52 = vld [vmem:[#allocation2 + $0x28] sm:$0xff] }
 0x111   : > { %1547 = vmatpush3.bf16.xpose.msra.mxu1 %v971_v50  ;;  %1528 = vmatprep.subr.bf16.mxu0 %v1755_v16  ;;  %v659_v55 = vadd.f32 %v1983_v47, %v658_v53  ;;  %v1489_v57 = vpop.f32.mrb[18].mxu0  ;;  %v798_v58 = vadd.f32 %v1989_v18, %v797_v56  ;;  %v1509_v60 = vpop.f32.mrb[18].mxu1 }
 0x112   : > { %1548 = vmatprep.subr.bf16.mxu1 %v1755_v16  ;;  %v670_v59 = vadd.f32 %v1489_v57, %v1983_v47  ;;  %v661_v61 = vpop.f32.mrb[19].mxu0  ;;  %v809_v62 = vadd.f32 %v1509_v60, %v1989_v18  ;;  %v800_v0 = vpop.f32.mrb[19].mxu1 }
 0x113   : > { %v662_v63 = vadd.f32 %v1983_v47, %v661_v61  ;;  %v801_v3 = vadd.f32 %v1989_v18, %v800_v0 }
 0x114   : > { %v722_v2 = vpack.c.bf16 %v670_v59, %v667_v51  ;;  %v861_v5 = vpack.c.bf16 %v809_v62, %v806_v54  ;;  %v906_v59 = vsel %vm322_vm0, %v883_v52, 0 }
 0x115   : > { %v721_v6 = vpack.c.bf16 %v662_v63, %v659_v55  ;;  %v860_v7 = vpack.c.bf16 %v801_v3, %v798_v58  ;;  %v961_v55 = vld [vmem:[#allocation2 + $0x68] sm:$0xff] }
 0x116   : > { %731 = vst.msk [vmem:[#allocation2 + $0x88] sm:$0xff] %vm322_vm0, %v722_v2  ;;  %870 = vst.msk [vmem:[#allocation2 + $0xc8] sm:$0xff] %vm322_vm0, %v861_v5  ;;  %v980_v61 = vsel %vm322_vm0, %v961_v55, 0 }
 0x117   : > { %730 = vst.msk [vmem:[#allocation2 + $0x80] sm:$0xff] %vm322_vm0, %v721_v6  ;;  %v1492_v9 = vpop.f32.mrb[20].mxu0  ;;  %869 = vst.msk [vmem:[#allocation2 + $0xc0] sm:$0xff] %vm322_vm0, %v860_v7  ;;  %v1512_v12 = vpop.f32.mrb[20].mxu1 }
 0x118   : > { %1529 = vmatpush3.bf16.xpose.msra.mxu0 %v900_v8  ;;  %v683_v11 = vadd.f32 %v1492_v9, %v1983_v47  ;;  %v674_v13 = vpop.f32.mrb[21].mxu0  ;;  %v822_v14 = vadd.f32 %v1512_v12, %v1989_v18  ;;  %v813_v17 = vpop.f32.mrb[21].mxu1  ;;  %v884_v12 = vld [vmem:[#allocation2 + $0x30] sm:$0xff] }
 0x119   : > { %1549 = vmatpush3.bf16.xpose.msra.mxu1 %v974_v10  ;;  %1530 = vmatprep.subr.bf16.mxu0 %v1755_v16  ;;  %v675_v15 = vadd.f32 %v1983_v47, %v674_v13  ;;  %v1493_v19 = vpop.f32.mrb[22].mxu0  ;;  %v814_v21 = vadd.f32 %v1989_v18, %v813_v17  ;;  %v1513_v23 = vpop.f32.mrb[22].mxu1 }
 0x11a   : > { %1550 = vmatprep.subr.bf16.mxu1 %v1755_v16  ;;  %v686_v22 = vadd.f32 %v1493_v19, %v1983_v47  ;;  %v677_v24 = vpop.f32.mrb[23].mxu0  ;;  %v825_v25 = vadd.f32 %v1513_v23, %v1989_v18  ;;  %v816_v27 = vpop.f32.mrb[23].mxu1  ;;  %v963_v23 = vld [vmem:[#allocation2 + $0x78] sm:$0xff] }
 0x11b   : > { %v678_v26 = vadd.f32 %v1983_v47, %v677_v24  ;;  %v817_v30 = vadd.f32 %v1989_v18, %v816_v27 }
 0x11c   : > { %v724_v29 = vpack.c.bf16 %v686_v22, %v683_v11  ;;  %v863_v32 = vpack.c.bf16 %v825_v25, %v822_v14  ;;  %v909_v22 = vsel %vm322_vm0, %v884_v12, 0  ;;  %v986_v25 = vsel %vm322_vm0, %v963_v23, 0 }
 0x11d   : > { %v723_v33 = vpack.c.bf16 %v678_v26, %v675_v15  ;;  %v862_v34 = vpack.c.bf16 %v817_v30, %v814_v21  ;;  %v962_v15 = vld [vmem:[#allocation2 + $0x70] sm:$0xff]  ;;  %v2070_v26 = vld [vmem:[%s237_s30] sm:$0xf]  ;;  %v1031_v31 = vld [vmem:[#allocation2 + $0x88] sm:$0xff] }
 0x11e   : > { %733 = vst.msk [vmem:[#allocation2 + $0x98] sm:$0xff] %vm322_vm0, %v724_v29  ;;  %872 = vst.msk [vmem:[#allocation2 + $0xd8] sm:$0xff] %vm322_vm0, %v863_v32  ;;  %v1030_v27 = vld [vmem:[#allocation2 + $0x80] sm:$0xff]  ;;  %v1105_v32 = vld [vmem:[#allocation2 + $0xc8] sm:$0xff] }
 0x11f   : > { %732 = vst.msk [vmem:[#allocation2 + $0x90] sm:$0xff] %vm322_vm0, %v723_v33  ;;  %v1496_v36 = vpop.f32.mrb[24].mxu0  ;;  %871 = vst.msk [vmem:[#allocation2 + $0xd0] sm:$0xff] %vm322_vm0, %v862_v34  ;;  %v1516_v39 = vpop.f32.mrb[24].mxu1  ;;  %v1104_v28 = vld [vmem:[#allocation2 + $0xc0] sm:$0xff]  ;;  %v1039_v29 = vsel %vm322_vm0, %v1030_v27, 0 }
 0x120   : > { %1531 = vmatpush3.bf16.xpose.msra.mxu0 %v903_v35  ;;  %v699_v38 = vadd.f32 %v1496_v36, %v1983_v47  ;;  %v690_v40 = vpop.f32.mrb[25].mxu0  ;;  %v838_v41 = vadd.f32 %v1516_v39, %v1989_v18  ;;  %v829_v43 = vpop.f32.mrb[25].mxu1  ;;  %v1113_v30 = vsel %vm322_vm0, %v1104_v28, 0  ;;  %v1042_v33 = vsel %vm322_vm0, %v1031_v31, 0 }
 0x121   : > { %1551 = vmatpush3.bf16.xpose.msra.mxu1 %v977_v37  ;;  %1532 = vmatprep.subr.bf16.mxu0 %v1755_v16  ;;  %v691_v42 = vadd.f32 %v1983_v47, %v690_v40  ;;  %v1497_v44 = vpop.f32.mrb[26].mxu0  ;;  %v830_v45 = vadd.f32 %v1989_v18, %v829_v43  ;;  %v1517_v48 = vpop.f32.mrb[26].mxu1  ;;  %v1116_v34 = vsel %vm322_vm0, %v1105_v32, 0 }
 0x122   : > { %1552 = vmatprep.subr.bf16.mxu1 %v1755_v16  ;;  %v702_v46 = vadd.f32 %v1497_v44, %v1983_v47  ;;  %v693_v49 = vpop.f32.mrb[27].mxu0  ;;  %v841_v20 = vadd.f32 %v1517_v48, %v1989_v18  ;;  %v832_v51 = vpop.f32.mrb[27].mxu1 }
 0x123   : > { %v694_v50 = vadd.f32 %v1983_v47, %v693_v49  ;;  %v833_v54 = vadd.f32 %v1989_v18, %v832_v51 }
 0x124   : > { %v726_v53 = vpack.c.bf16 %v702_v46, %v699_v38  ;;  %v865_v56 = vpack.c.bf16 %v841_v20, %v838_v41 }
 0x125   : > { %v725_v57 = vpack.c.bf16 %v694_v50, %v691_v42  ;;  %v864_v58 = vpack.c.bf16 %v833_v54, %v830_v45  ;;  %v1033_v39 = vld [vmem:[#allocation2 + $0x98] sm:$0xff] }
 0x126   : > { %735 = vst.msk [vmem:[#allocation2 + $0xa8] sm:$0xff] %vm322_vm0, %v726_v53  ;;  %874 = vst.msk [vmem:[#allocation2 + $0xe8] sm:$0xff] %vm322_vm0, %v865_v56  ;;  %v1032_v35 = vld [vmem:[#allocation2 + $0x90] sm:$0xff]  ;;  %v1107_v40 = vld [vmem:[#allocation2 + $0xd8] sm:$0xff]  ;;  %v1048_v41 = vsel %vm322_vm0, %v1033_v39, 0 }
 0x127   : > { %734 = vst.msk [vmem:[#allocation2 + $0xa0] sm:$0xff] %vm322_vm0, %v725_v57  ;;  %v1500_v60 = vpop.f32.mrb[28].mxu0  ;;  %873 = vst.msk [vmem:[#allocation2 + $0xe0] sm:$0xff] %vm322_vm0, %v864_v58  ;;  %v1520_v63 = vpop.f32.mrb[28].mxu1  ;;  %v1106_v36 = vld [vmem:[#allocation2 + $0xd0] sm:$0xff]  ;;  %v1045_v37 = vsel %vm322_vm0, %v1032_v35, 0 }
 0x128   : > { %1533 = vmatpush3.bf16.xpose.msra.mxu0 %v906_v59  ;;  %v715_v62 = vadd.f32 %v1500_v60, %v1983_v47  ;;  %v706_v0 = vpop.f32.mrb[29].mxu0  ;;  %v854_v1 = vadd.f32 %v1520_v63, %v1989_v18  ;;  %v845_v3 = vpop.f32.mrb[29].mxu1  ;;  %v1119_v38 = vsel %vm322_vm0, %v1106_v36, 0  ;;  %v1122_v42 = vsel %vm322_vm0, %v1107_v40, 0 }
 0x129   : > { %1553 = vmatpush3.bf16.xpose.msra.mxu1 %v980_v61  ;;  %1534 = vmatprep.subr.bf16.mxu0 %v1755_v16  ;;  %v707_v2 = vadd.f32 %v1983_v47, %v706_v0  ;;  %v1501_v4 = vpop.f32.mrb[30].mxu0  ;;  %v846_v5 = vadd.f32 %v1989_v18, %v845_v3  ;;  %v1521_v7 = vpop.f32.mrb[30].mxu1 }
 0x12a   : > { %1554 = vmatprep.subr.bf16.mxu1 %v1755_v16  ;;  %v718_v6 = vadd.f32 %v1501_v4, %v1983_v47  ;;  %v709_v8 = vpop.f32.mrb[31].mxu0  ;;  %v857_v9 = vadd.f32 %v1521_v7, %v1989_v18  ;;  %v848_v11 = vpop.f32.mrb[31].mxu1 }
 0x12b   : > { %v710_v10 = vadd.f32 %v1983_v47, %v709_v8  ;;  %v849_v14 = vadd.f32 %v1989_v18, %v848_v11  ;;  %v983_v47 = vsel %vm322_vm0, %v962_v15, 0  ;;  %v885_v18 = vld [vmem:[#allocation2 + $0x38] sm:$0xff] }
 0x12c   : > { %v728_v13 = vpack.c.bf16 %v718_v6, %v715_v62  ;;  %v867_v17 = vpack.c.bf16 %v857_v9, %v854_v1  ;;  %v912_v24 = vsel %vm322_vm0, %v885_v18, 0 }
 0x12d   : > { %v727_v19 = vpack.c.bf16 %v710_v10, %v707_v2  ;;  %v866_v21 = vpack.c.bf16 %v849_v14, %v846_v5  ;;  %v1035_v48 = vld [vmem:[#allocation2 + $0xa8] sm:$0xff] }
 0x12e   : > { %737 = vst.msk [vmem:[#allocation2 + $0xb8] sm:$0xff] %vm322_vm0, %v728_v13  ;;  %876 = vst.msk [vmem:[#allocation2 + $0xf8] sm:$0xff] %vm322_vm0, %v867_v17  ;;  %v1034_v43 = vld [vmem:[#allocation2 + $0xa0] sm:$0xff]  ;;  %v1109_v49 = vld [vmem:[#allocation2 + $0xe8] sm:$0xff]  ;;  %v1054_v20 = vsel %vm322_vm0, %v1035_v48, 0 }
 0x12f   : > { %736 = vst.msk [vmem:[#allocation2 + $0xb0] sm:$0xff] %vm322_vm0, %v727_v19  ;;  %875 = vst.msk [vmem:[#allocation2 + $0xf0] sm:$0xff] %vm322_vm0, %v866_v21  ;;  %v1108_v44 = vld [vmem:[#allocation2 + $0xe0] sm:$0xff]  ;;  %v1051_v45 = vsel %vm322_vm0, %v1034_v43, 0  ;;  %v1128_v50 = vsel %vm322_vm0, %v1109_v49, 0 }
 0x130   : > { %1535 = vmatpush3.bf16.xpose.msra.mxu0 %v909_v22  ;;  %v1125_v46 = vsel %vm322_vm0, %v1108_v44, 0 }
 0x131   : > { %1555 = vmatpush3.bf16.xpose.msra.mxu1 %v983_v47  ;;  %1536 = vmatprep.subr.bf16.mxu0 %v1755_v16 }
 0x132   : > { %1556 = vmatprep.subr.bf16.mxu1 %v1755_v16 }
 0x135   : > { %v1037_v55 = vld [vmem:[#allocation2 + $0xb8] sm:$0xff] }
 0x136   : > { %v1036_v51 = vld [vmem:[#allocation2 + $0xb0] sm:$0xff]  ;;  %v1111_v56 = vld [vmem:[#allocation2 + $0xf8] sm:$0xff]  ;;  %v1060_v57 = vsel %vm322_vm0, %v1037_v55, 0 }
 0x137   : > { %v1110_v52 = vld [vmem:[#allocation2 + $0xf0] sm:$0xff]  ;;  %v1057_v53 = vsel %vm322_vm0, %v1036_v51, 0  ;;  %v1134_v58 = vsel %vm322_vm0, %v1111_v56, 0 }
 0x138   : > { %1537 = vmatpush3.bf16.xpose.msra.mxu0 %v912_v24  ;;  %v1131_v54 = vsel %vm322_vm0, %v1110_v52, 0 }
 0x139   : > { %1557 = vmatpush3.bf16.xpose.msra.mxu1 %v986_v25  ;;  %1562 = vmatprep.subr.bf16.mxu0 %v1755_v16 }
 0x13a   : > { %1582 = vmatprep.subr.bf16.mxu1 %v1755_v16 }
 0x13f   : > { %1539 = vmatmul.mubr.msk.bf16.vlgmr.msra.gmra.mrb[32].mxu0 %vm322_vm0, %v2070_v26 }
 0x140   : > { %1559 = vmatmul.mubr.msk.bf16.vlgmr.msra.gmra.mrb[32].mxu1 %vm322_vm0, %v2070_v26  ;;  %1563 = vmatpush3.bf16.xpose.msra.mxu0 %v1039_v29 }
 0x141   : > { %1583 = vmatpush3.bf16.xpose.msra.mxu1 %v1113_v30  ;;  %1564 = vmatprep.subr.bf16.mxu0 %v1755_v16 }
 0x142   : > { %1584 = vmatprep.subr.bf16.mxu1 %v1755_v16  ;;  %1578 = vmatprep.mubr.msk.bf16.mxu0 %vm1756_vm1, %v1755_v16 }
 0x143   : > { %1598 = vmatprep.mubr.msk.bf16.mxu1 %vm1756_vm1, %v1755_v16 }
 0x148   : > { %1565 = vmatpush3.bf16.xpose.msra.mxu0 %v1042_v33 }
 0x149   : > { %1585 = vmatpush3.bf16.xpose.msra.mxu1 %v1116_v34  ;;  %1566 = vmatprep.subr.bf16.mxu0 %v1755_v16 }
 0x14a   : > { %1586 = vmatprep.subr.bf16.mxu1 %v1755_v16 }
 0x150   : > { %1567 = vmatpush3.bf16.xpose.msra.mxu0 %v1045_v37 }
 0x151   : > { %1587 = vmatpush3.bf16.xpose.msra.mxu1 %v1119_v38  ;;  %1568 = vmatprep.subr.bf16.mxu0 %v1755_v16 }
 0x152   : > { %1588 = vmatprep.subr.bf16.mxu1 %v1755_v16 }
 0x158   : > { %1569 = vmatpush3.bf16.xpose.msra.mxu0 %v1048_v41 }
 0x159   : > { %1589 = vmatpush3.bf16.xpose.msra.mxu1 %v1122_v42  ;;  %1570 = vmatprep.subr.bf16.mxu0 %v1755_v16 }
 0x15a   : > { %1590 = vmatprep.subr.bf16.mxu1 %v1755_v16 }
 0x160   : > { %1571 = vmatpush3.bf16.xpose.msra.mxu0 %v1051_v45 }
 0x161   : > { %1591 = vmatpush3.bf16.xpose.msra.mxu1 %v1125_v46  ;;  %1572 = vmatprep.subr.bf16.mxu0 %v1755_v16 }
 0x162   : > { %1592 = vmatprep.subr.bf16.mxu1 %v1755_v16 }
 0x168   : > { %1573 = vmatpush3.bf16.xpose.msra.mxu0 %v1054_v20 }
 0x169   : > { %1593 = vmatpush3.bf16.xpose.msra.mxu1 %v1128_v50  ;;  %1574 = vmatprep.subr.bf16.mxu0 %v1755_v16 }
 0x16a   : > { %1594 = vmatprep.subr.bf16.mxu1 %v1755_v16 }
 0x170   : > { %1575 = vmatpush3.bf16.xpose.msra.mxu0 %v1057_v53 }
 0x171   : > { %1595 = vmatpush3.bf16.xpose.msra.mxu1 %v1131_v54  ;;  %1576 = vmatprep.subr.bf16.mxu0 %v1755_v16 }
 0x172   : > { %1596 = vmatprep.subr.bf16.mxu1 %v1755_v16 }
 0x178   : > { %1577 = vmatpush3.bf16.xpose.msra.mxu0 %v1060_v57 }
 0x179   : > { %1597 = vmatpush3.bf16.xpose.msra.mxu1 %v1134_v58 }
 0x17f   : > { %1579 = vmatmul.mubr.msk.bf16.vlgmr.msra.gmra.mrb[36].mxu0 %vm322_vm0, %v2070_v26 }
 0x180   : > { %1599 = vmatmul.mubr.msk.bf16.vlgmr.msra.gmra.mrb[36].mxu1 %vm322_vm0, %v2070_v26 }
 0x212   : > { %v948_v59 = vpop.f32.mrb[32].mxu0 }
 0x213   : > { %954 = vst [vmem:[%s225_s6] sm:$0xff] %v948_v59  ;;  %v1022_v16 = vpop.f32.mrb[32].mxu1  ;;  %v1540_v60 = vpop.f32.mrb[33].mxu0 }
 0x214   : > { %1028 = vst [vmem:[%s225_s6 + $0x8] sm:$0xff] %v1022_v16  ;;  %v1560_v61 = vpop.f32.mrb[33].mxu1  ;;  %v951_v62 = vpop.f32.mrb[34].mxu0 }
 0x215   : > { %v1025_v63 = vpop.f32.mrb[34].mxu1  ;;  %v1541_v0 = vpop.f32.mrb[35].mxu0 }
 0x216   : > { %v1561_v1 = vpop.f32.mrb[35].mxu1 }
 0x252   : > { %v1096_v2 = vpop.f32.mrb[36].mxu0 }
 0x253   : > { %1102 = vst [vmem:[%s225_s6 + $0x10] sm:$0xff] %v1096_v2  ;;  %v1170_v3 = vpop.f32.mrb[36].mxu1  ;;  %v1580_v4 = vpop.f32.mrb[37].mxu0 }
 0x254   : > { %1176 = vst [vmem:[%s225_s6 + $0x18] sm:$0xff] %v1170_v3  ;;  %v1600_v5 = vpop.f32.mrb[37].mxu1  ;;  %v1099_v6 = vpop.f32.mrb[38].mxu0 }
 0x255   : > { %v1173_v7 = vpop.f32.mrb[38].mxu1  ;;  %v1581_v8 = vpop.f32.mrb[39].mxu0 }
 0x256   : > { %1688 = shalt.err (!%p1685_p5)
}
 0x257   : > { %s1689_s24 = scalar_lea.hbm %s2119_s12, 512  ;;  %s1693_s30 = scalar_lea.hbm %s2170_s4, 1024 }
 0x258   : > { %p1690_p6 = scmp.ne.s32.totalorder %s2119_s12, %s1689_s24  ;;  %p1694_p10 = scmp.lt.u32.totalorder %s2119_s12, %s2170_s4 }
 0x259   : > { %p1695_p11 = scmp.lt.u32.totalorder %s1693_s30, %s1689_s24  ;;  %p1697_p13 = scmp.lt.u32.totalorder %s1689_s24, %s2119_s12 }
 0x25a   : > { %p1691_p7 = pnand %p1690_p6, %p1823_p4 }
 0x25b   : > { %p1696_p12 = por %p1695_p11, %p1694_p10 }
 0x25c   : > { %p1692_p9 = pneg %p1691_p7 }
 0x25d   : > { %p1698_p0 = por %p1697_p13, %p1696_p12 }
 0x25f   : > { %p1699_p1 = pnand %p1698_p0, %p1692_p9 }
 0x261   : > { %1702 = shalt.err (!%p1699_p1)
}
 0x262   : > { %1602 = dma.vmem_to_hbm [thread:$0]  (%p1823_p4), %s2121_s8, 512, %s2119_s12, %s1178_s18   ;;  %v1601_v9 = vpop.f32.mrb[39].mxu1 }
 0x263 PF: > { %p1608_p2 = scmp.ge.s32.totalorder %s1753_s20, 2  ;;  %s1206_s6 = sand.u32 1, %s1733_s15  }
 0x264   : > { %s1207_s7 = scalar_lea.sflag [#allocation4], %s1206_s6 }
 0x265   : > { %p1605_p3 = pnand %p1608_p2, %p1830_p8 }
 0x267   : > { %1728 = dma.done.wait (!%p1605_p3), %s1207_s7, 512  }
 0x268   : > { %1730 = vsyncadd (!%p1605_p3), %s1207_s7, 4294966784  ;;  %s17_s20 = sadd.s32 1, %s1753_s20   ;;  %s2173_s15 = smov %s1737_s16 }
 0x269   : > { %p14_p5 = scmp.ge.s32.totalorder %s17_s20, 4   ;;  %s2174_s16 = smov %s1741_s17 }
 0x26a   : > { %s2175_s17 = smov %s1836_s28  ;;  %s2176_s18 = smov %s1749_s19 }
 0x26b   : > { %s2177_s19 = smov %s2179_s23  ;;  %16 = sbr.rel (!%p14_p5) target bundleno = 4 (0x4), region = 90 }
 0x272   :  { %1212 = vsyncpa [#allocation4], 1 }
 0x273   :  { %1214 = vsyncpa [#allocation4 + $0x1], 1 }

</bundles_post_ra>
